<compile_context>
chip_gen: v7x
topology: tpu7x:2x2x1
jax: 0.10.0
libtpu: 0.0.40
codegen_flags: <defaults>
</compile_context>

<pallas_src>
import functools
import math

import jax
import jax.numpy as jnp
from jax.experimental import pallas as pl
from jax.experimental.pallas import tpu as pltpu


def _round_up(x, m):
    return ((x + m - 1) // m) * m


def _vmem_limit_bytes():
    """Generation-aware VMEM budget: 75% of physical VMEM (~96 MiB on
    v5e/v6e, ~48 MiB on v7x); conservative 48 MiB fallback if the hardware
    query is unavailable."""
    cap = None
    try:
        info = pltpu.get_tpu_info()
        cap = int(getattr(info, "vmem_capacity_bytes", 0)) or None
    except Exception:
        cap = None
    if cap is None:
        cap = 64 * 1024 * 1024  # v7x per-TC value: safe on every generation
    limit = (cap * 3 // 4) // (1024 * 1024) * (1024 * 1024)
    return max(limit, 32 * 1024 * 1024)


def _grecurrent_cell_kernel(x_ref, h_ref, w_ih_ref, w_hh_ref, b_ref, out_ref,
                            *, nonlinearity):
    # bf16 MXU operands, f32 accumulation; bias + nonlinearity stay f32.
    x = x_ref[...].astype(jnp.bfloat16)
    h = h_ref[...].astype(jnp.bfloat16)
    pre = jnp.dot(x, w_ih_ref[...], preferred_element_type=jnp.float32)
    pre = pre + jnp.dot(h, w_hh_ref[...], preferred_element_type=jnp.float32)
    pre = pre + b_ref[...]
    if nonlinearity == "tanh":
        act = jnp.tanh(pre)            # EUP slot, off the VALU critical path
    else:  # 'relu'
        act = jnp.maximum(pre, 0.0)    # VPU
    out_ref[...] = act.astype(out_ref.dtype)


class GRecurrentCellPallas:
    """JAX/Pallas port of GRecurrentCell with a concrete Elman-RNN forward."""

    _SPLIT_ROWS = 1024   # row counts below this run as a single block
    _MAX_TM = 8192       # diminishing returns past this tile size

    def __init__(self, group_size, input_size, hidden_size,
                 nonlinearity="tanh", out_dtype=jnp.bfloat16):
        assert nonlinearity in ("tanh", "relu"), "not one of 'tanh' or 'relu'"
        self.group_size = group_size
        self.input_size = input_size
        self.hidden_size = hidden_size
        self.nonlinearity = nonlinearity
        self.out_dtype = jnp.dtype(out_dtype)

        self._vmem_limit = _vmem_limit_bytes()

        # ---- output-column tiling (only kicks in for very large hidden) ----
        K = input_size + hidden_size
        fused_w_bytes = 2 * K * hidden_size                 # bf16 [W_ih; W_hh]
        if 2 * fused_w_bytes > self._vmem_limit // 3:
            tn = (self._vmem_limit // 6) // (2 * 2 * K)      # weight block <= ~budget/6
            tn = max(128, (tn // 128) * 128)
            self._tn = min(tn, _round_up(hidden_size, 128))
            self._h_cols = _round_up(hidden_size, self._tn)
        else:
            self._tn = hidden_size
            self._h_cols = hidden_size

        # ---- budget-derived row tile (used once M >= _SPLIT_ROWS) ----
        in_row = 2 * 4 * K                                   # f32 x+h, double-buffered
        out_row = 2 * self.out_dtype.itemsize * self._tn     # out block, double-buffered
        w_block = 2 * (2 * K * self._tn + 4 * self._tn)      # weight + bias blocks
        avail = self._vmem_limit - w_block - (4 << 20)       # headroom
        tm = max(1024, avail // max(in_row + out_row, 1))
        self._tm_budget = min((tm // 8) * 8, self._MAX_TM)

        # ---- deterministic parameters (PyTorch RNNCell-style uniform init) ----
        key = jax.random.PRNGKey(0)
        k1, k2, k3, k4 = jax.random.split(key, 4)
        bound = 1.0 / math.sqrt(hidden_size)
        w_ih = jax.random.uniform(k1, (input_size, hidden_size), jnp.float32,
                                  -bound, bound)
        w_hh = jax.random.uniform(k2, (hidden_size, hidden_size), jnp.float32,
                                  -bound, bound)
        b_ih = jax.random.uniform(k3, (hidden_size,), jnp.float32, -bound, bound)
        b_hh = jax.random.uniform(k4, (hidden_size,), jnp.float32, -bound, bound)

        # bf16 MXU weights; zero-padded columns (only when H is column-tiled)
        # produce act(0 + 0) in sliced-off lanes -> exact.
        hc = self._h_cols
        self.w_ih = (jnp.zeros((input_size, hc), jnp.float32)
                     .at[:, :hidden_size].set(w_ih).astype(jnp.bfloat16))
        self.w_hh = (jnp.zeros((hidden_size, hc), jnp.float32)
                     .at[:, :hidden_size].set(w_hh).astype(jnp.bfloat16))
        self.bias = (jnp.zeros((1, hc), jnp.float32)
                     .at[0, :hidden_size].set(b_ih + b_hh))

    def init_hidden(self, batch=1):
        # Matches GRecurrentCell.init_hidden(): zeros(1, |G|, hidden_size).
        return jnp.zeros((batch, self.group_size, self.hidden_size),
                         jnp.float32)

    def _row_tiling(self, M):
        if M < self._SPLIT_ROWS:
            return M, M, 1                         # single block, no padding
        # Budget-sized tile, capped to keep >= 2 grid steps (v7x dual-TC).
        tm = min(self._tm_budget, _round_up(pl.cdiv(M, 2), 8))
        M_pad = _round_up(M, tm)
        return tm, M_pad, M_pad // tm

    def __call__(self, x, h):
        B, G, I = x.shape
        assert G == self.group_size and I == self.input_size
        assert h.shape == (B, G, self.hidden_size)
        H, hc, tn = self.hidden_size, self._h_cols, self._tn
        M = B * G

        tm, M_pad, grid_m = self._row_tiling(M)
        grid_n = hc // tn

        x2 = x.reshape(M, I)
        h2 = h.reshape(M, H)
        if M_pad != M:
            x2 = jnp.pad(x2, ((0, M_pad - M), (0, 0)))
            h2 = jnp.pad(h2, ((0, M_pad - M), (0, 0)))

        cost = pl.CostEstimate(
            flops=2 * M_pad * (I + H) * hc,
            transcendentals=(M_pad * hc if self.nonlinearity == "tanh" else 0),
            bytes_accessed=int(x2.size * x2.dtype.itemsize
                               + h2.size * h2.dtype.itemsize
                               + self.w_ih.size * 2 + self.w_hh.size * 2
                               + self.bias.size * 4
                               + M_pad * hc * self.out_dtype.itemsize),
        )

        kernel = functools.partial(_grecurrent_cell_kernel,
                                   nonlinearity=self.nonlinearity)
        out = pl.pallas_call(
            kernel,
            out_shape=jax.ShapeDtypeStruct((M_pad, hc), self.out_dtype),
            grid=(grid_m, grid_n),
            in_specs=[
                pl.BlockSpec((tm, I), lambda i, j: (i, 0)),   # x rows
                pl.BlockSpec((tm, H), lambda i, j: (i, 0)),   # h rows
                pl.BlockSpec((I, tn), lambda i, j: (0, j)),   # W_ih cols
                pl.BlockSpec((H, tn), lambda i, j: (0, j)),   # W_hh cols
                pl.BlockSpec((1, tn), lambda i, j: (0, j)),   # bias cols
            ],
            out_specs=pl.BlockSpec((tm, tn), lambda i, j: (i, j)),
            compiler_params=pltpu.CompilerParams(
                dimension_semantics=("parallel", "parallel"),
                vmem_limit_bytes=self._vmem_limit,
            ),
            cost_estimate=cost,
        )(x2, h2, self.w_ih, self.w_hh, self.bias)

        if M_pad != M or hc != H:
            out = out[:M, :H]
        return out.reshape(B, G, H)


def _reference(cell, x, h):
    # f32 math on the same bf16-rounded operands the kernel feeds the MXU.
    B, G, _ = x.shape
    H = cell.hidden_size
    xb = x.reshape(B * G, -1).astype(jnp.bfloat16).astype(jnp.float32)
    hb = h.reshape(B * G, H).astype(jnp.bfloat16).astype(jnp.float32)
    w_ih = cell.w_ih[:, :H].astype(jnp.float32)
    w_hh = cell.w_hh[:, :H].astype(jnp.float32)
    b = cell.bias[0, :H]
    pre = xb @ w_ih + hb @ w_hh + b
    act = jnp.tanh(pre) if cell.nonlinearity == "tanh" else jnp.maximum(pre, 0.0)
    return act.reshape(B, G, H)


if __name__ == "__main__":
    # Shapes the module implies: x (B, |G|, input), h (B, |G|, hidden).
    batch, group_size, input_size, hidden_size = 2, 4, 32, 32

    cell = GRecurrentCellPallas(group_size, input_size, hidden_size,
                                nonlinearity="tanh")

    key = jax.random.PRNGKey(0)
    kx, kh = jax.random.split(key)
    x = jax.random.normal(kx, (batch, group_size, input_size), jnp.float32)
    h = jax.random.normal(kh, (batch, group_size, hidden_size), jnp.float32)

    out = jax.block_until_ready(cell(x, h))
    assert out.shape == (batch, group_size, hidden_size)
    assert out.dtype == cell.out_dtype

    ref = _reference(cell, x, h)
    err = float(jnp.max(jnp.abs(out.astype(jnp.float32) - ref)))
    assert err < 2e-2, f"tanh cell max abs err = {err}"

    # relu nonlinearity variant.
    cell_r = GRecurrentCellPallas(group_size, input_size, hidden_size,
                                  nonlinearity="relu")
    out_r = jax.block_until_ready(cell_r(x, h))
    ref_r = _reference(cell_r, x, h)
    err_r = float(jnp.max(jnp.abs(out_r.astype(jnp.float32) - ref_r)))
    assert err_r < 2e-2, f"relu cell max abs err = {err_r}"

    # Exercise the tiled-row path (grid_m > 1): M = B*|G| = 2048.
    big_b, big_g = 64, 32
    cell_big = GRecurrentCellPallas(big_g, input_size, hidden_size, "tanh")
    kx2, kh2 = jax.random.split(jax.random.PRNGKey(1))
    xb = jax.random.normal(kx2, (big_b, big_g, input_size), jnp.float32)
    hb = jax.random.normal(kh2, (big_b, big_g, hidden_size), jnp.float32)
    out_b = jax.block_until_ready(cell_big(xb, hb))
    ref_b = _reference(cell_big, xb, hb)
    err_b = float(jnp.max(jnp.abs(out_b.astype(jnp.float32) - ref_b)))
    assert err_b < 2e-2, f"tiled-row cell max abs err = {err_b}"

    # init_hidden parity with the PyTorch module: zeros(1, |G|, hidden_size).
    h0 = cell.init_hidden()
    assert h0.shape == (1, group_size, hidden_size)

    print("KERNEL_OK")
</pallas_src>

<mosaic_0001>
module attributes {stable_mosaic.version = 11 : i64} {
  func.func @_grecurrent_cell_kernel(%arg0: i32, %arg1: i32, %arg2: memref<8x32xf32, #tpu.memory_space<vmem>>, %arg3: memref<8x32xf32, #tpu.memory_space<vmem>>, %arg4: memref<32x32xbf16, #tpu.memory_space<vmem>>, %arg5: memref<32x32xbf16, #tpu.memory_space<vmem>>, %arg6: memref<1x32xf32, #tpu.memory_space<vmem>>, %arg7: memref<8x32xbf16, #tpu.memory_space<vmem>>) attributes {dimension_semantics = [#tpu.dimension_semantics<parallel>, #tpu.dimension_semantics<parallel>], iteration_bounds = array<i64: 1, 1>, scalar_prefetch = 0 : i64, scratch_operands = 0 : i64, tpu.core_type = #tpu.core_type<tc>, window_params = [{transform_indices = @transform_0, window_bounds = array<i64: 8, 32>}, {transform_indices = @transform_1, window_bounds = array<i64: 8, 32>}, {transform_indices = @transform_2, window_bounds = array<i64: 32, 32>}, {transform_indices = @transform_3, window_bounds = array<i64: 32, 32>}, {transform_indices = @transform_4, window_bounds = array<i64: 1, 32>}, {transform_indices = @transform_5, window_bounds = array<i64: 8, 32>}]} {
    %c0 = arith.constant 0 : index
    %c0_0 = arith.constant 0 : index
    %0 = vector.load %arg2[%c0, %c0_0] : memref<8x32xf32, #tpu.memory_space<vmem>>, vector<8x32xf32>
    %1 = arith.truncf %0 : vector<8x32xf32> to vector<8x32xbf16>
    %c0_1 = arith.constant 0 : index
    %c0_2 = arith.constant 0 : index
    %2 = vector.load %arg3[%c0_1, %c0_2] : memref<8x32xf32, #tpu.memory_space<vmem>>, vector<8x32xf32>
    %3 = arith.truncf %2 : vector<8x32xf32> to vector<8x32xbf16>
    %c0_3 = arith.constant 0 : index
    %c0_4 = arith.constant 0 : index
    %4 = vector.load %arg4[%c0_3, %c0_4] : memref<32x32xbf16, #tpu.memory_space<vmem>>, vector<32x32xbf16>
    %cst = arith.constant dense<0.000000e+00> : vector<8x32xf32>
    %5 = tpu.matmul %1, %4, %cst {dimension_numbers = #tpu.dot_dimension_numbers<[1], [0], [0], [1], [0, 0, 1, 1], [], []>} : vector<8x32xbf16>, vector<32x32xbf16>, vector<8x32xf32> -> vector<8x32xf32>
    %c0_5 = arith.constant 0 : index
    %c0_6 = arith.constant 0 : index
    %6 = vector.load %arg5[%c0_5, %c0_6] : memref<32x32xbf16, #tpu.memory_space<vmem>>, vector<32x32xbf16>
    %cst_7 = arith.constant dense<0.000000e+00> : vector<8x32xf32>
    %7 = tpu.matmul %3, %6, %cst_7 {dimension_numbers = #tpu.dot_dimension_numbers<[1], [0], [0], [1], [0, 0, 1, 1], [], []>} : vector<8x32xbf16>, vector<32x32xbf16>, vector<8x32xf32> -> vector<8x32xf32>
    %8 = arith.addf %5, %7 : vector<8x32xf32>
    %c0_8 = arith.constant 0 : index
    %c0_9 = arith.constant 0 : index
    %9 = vector.load %arg6[%c0_8, %c0_9] : memref<1x32xf32, #tpu.memory_space<vmem>>, vector<1x32xf32>
    %10 = vector.broadcast %9 : vector<1x32xf32> to vector<8x32xf32>
    %11 = arith.addf %8, %10 : vector<8x32xf32>
    %12 = math.tanh %11 : vector<8x32xf32>
    %13 = arith.truncf %12 : vector<8x32xf32> to vector<8x32xbf16>
    %c0_10 = arith.constant 0 : index
    %c0_11 = arith.constant 0 : index
    %14 = vector.load %arg7[%c0_10, %c0_11] : memref<8x32xbf16, #tpu.memory_space<vmem>>, vector<8x32xbf16>
    tpu.vector_store %arg7[%c0_10, %c0_11], %13 {strides = array<i32>} : memref<8x32xbf16, #tpu.memory_space<vmem>>, vector<8x32xbf16>,
    return
  }
  func.func @transform_0(%arg0: i32, %arg1: i32) -> (i32, i32) {
    %c0_i32 = arith.constant 0 : i32
    %c0_i32_0 = arith.constant 0 : i32
    return %arg0, %c0_i32 : i32, i32
  }
  func.func @transform_1(%arg0: i32, %arg1: i32) -> (i32, i32) {
    %c0_i32 = arith.constant 0 : i32
    %c0_i32_0 = arith.constant 0 : i32
    return %arg0, %c0_i32 : i32, i32
  }
  func.func @transform_2(%arg0: i32, %arg1: i32) -> (i32, i32) {
    %c0_i32 = arith.constant 0 : i32
    %c0_i32_0 = arith.constant 0 : i32
    return %c0_i32, %arg1 : i32, i32
  }
  func.func @transform_3(%arg0: i32, %arg1: i32) -> (i32, i32) {
    %c0_i32 = arith.constant 0 : i32
    %c0_i32_0 = arith.constant 0 : i32
    return %c0_i32, %arg1 : i32, i32
  }
  func.func @transform_4(%arg0: i32, %arg1: i32) -> (i32, i32) {
    %c0_i32 = arith.constant 0 : i32
    %c0_i32_0 = arith.constant 0 : i32
    return %c0_i32, %arg1 : i32, i32
  }
  func.func @transform_5(%arg0: i32, %arg1: i32) -> (i32, i32) {
    %c0_i32 = arith.constant 0 : i32
    return %arg0, %arg1 : i32, i32
  }
}

</mosaic_0001>

<bundles_post_ra>
// kernel: tpu_custom_call.1
= control target key start
LH: loop header
LB: loop body
LE: loop exit
PB: predicated region body
PF: predicated region fallthrough
CT: control target
= control target key end

     0   :  { %10 = vsyncpa [#allocation3], 0  ;;  %s489_s0 = inlined_call_operand.hbm [shape: f32[8,32], index: 0, kind: input, shape index: {}]   ;;  %s490_s1 = inlined_call_operand.hbm [shape: f32[8,32], index: 1, kind: input, shape index: {}]   ;;  %s491_s2 = inlined_call_operand.hbm [shape: bf16[32,32], index: 2, kind: input, shape index: {}]   ;;  %s492_s3 = inlined_call_operand.hbm [shape: bf16[32,32], index: 3, kind: input, shape index: {}]   ;;  %s493_s4 = inlined_call_operand.vmem [shape: f32[1,32], index: 4, kind: input, shape index: {}]   ;;  %s494_s5 = inlined_call_operand.hbm [shape: bf16[8,32], index: 5, kind: output, shape index: {}]  }
   0x1   :  { %11 = vsyncpa [#allocation6], 0 }
   0x2   :  { %12 = vsyncpa [#allocation9], 0 }
   0x3   :  { %13 = vsyncpa [#allocation4], 0  ;;  %s387_s18 = smov [#allocation5]   ;;  %s388_s20 = smov [#allocation2]  }
   0x4   :  { %s30_s19 = sshll.u32 %s387_s18, 4  ;;  %s20_s21 = sshll.u32 %s388_s20, 4  ;;  %s31_s19 = int_to_ptr.vmem [resolvable:$true] %s30_s19  ;;  %s21_s21 = int_to_ptr.vmem [resolvable:$true] %s20_s21 }
   0x5   :  { %s269_s24 = scalar_lea.hbm %s490_s1, 128 }
   0x6   :  { %p270_p0 = scmp.ne.s32.totalorder %s490_s1, %s269_s24  ;;  %p273_p1 = scmp.lt.u32.totalorder %s269_s24, %s490_s1 }
   0x8   :  { %p275_p2 = pnand %p273_p1, %p270_p0 }
   0xa   :  { %278 = shalt.err (!%p275_p2)
}
   0xb   :  { %s279_s29 = scalar_lea.vmem %s31_s19, 128  ;;  %p284_p4 = scmp.lt.s32.totalorder %s31_s19, %s31_s19 }
   0xc   :  { %p280_p3 = scmp.ne.s32.totalorder %s31_s19, %s279_s29  ;;  %p285_p5 = scmp.lt.s32.totalorder %s279_s29, %s279_s29 }
   0xe   :  { %p286_p6 = por %p285_p5, %p284_p4 }
  0x10   :  { %p287_p7 = pnand %p286_p6, %p280_p3 }
  0x12   :  { %290 = shalt.err (!%p287_p7)
}
  0x13   :  { %33 = dma.hbm_to_vmem [thread:$0]  %s490_s1, 128, %s31_s19, [#allocation6]  }
  0x14   :  { %s291_s9 = scalar_lea.hbm %s489_s0, 128 }
  0x15   :  { %p292_p8 = scmp.ne.s32.totalorder %s489_s0, %s291_s9  ;;  %p295_p9 = scmp.lt.u32.totalorder %s291_s9, %s489_s0 }
  0x17   :  { %p297_p10 = pnand %p295_p9, %p292_p8 }
  0x19   :  { %300 = shalt.err (!%p297_p10)
}
  0x1a   :  { %s301_s14 = scalar_lea.vmem %s21_s21, 128  ;;  %p306_p12 = scmp.lt.s32.totalorder %s21_s21, %s21_s21 }
  0x1b   :  { %p302_p11 = scmp.ne.s32.totalorder %s21_s21, %s301_s14  ;;  %p307_p13 = scmp.lt.s32.totalorder %s301_s14, %s301_s14 }
  0x1d   :  { %p308_p0 = por %p307_p13, %p306_p12 }
  0x1f   :  { %p309_p1 = pnand %p308_p0, %p302_p11 }
  0x21   :  { %312 = shalt.err (!%p309_p1)
}
  0x22   :  { %23 = dma.hbm_to_vmem [thread:$0]  %s489_s0, 128, %s21_s21, [#allocation3]  }
  0x23   :  { %s389_s16 = smov [#allocation7]   ;;  %s313_s20 = scalar_lea.hbm %s491_s2, 256 }
  0x24   :  { %s39_s17 = sshll.u32 %s389_s16, 4  ;;  %p314_p2 = scmp.ne.s32.totalorder %s491_s2, %s313_s20  ;;  %s40_s17 = int_to_ptr.vmem [resolvable:$true] %s39_s17 }
  0x25   :  { %p317_p3 = scmp.lt.u32.totalorder %s313_s20, %s491_s2 }
  0x27   :  { %p319_p4 = pnand %p317_p3, %p314_p2 }
  0x29   :  { %322 = shalt.err (!%p319_p4)
}
  0x2a   :  { %s323_s26 = scalar_lea.vmem %s40_s17, 256  ;;  %p328_p6 = scmp.lt.s32.totalorder %s40_s17, %s40_s17 }
  0x2b   :  { %p324_p5 = scmp.ne.s32.totalorder %s40_s17, %s323_s26  ;;  %p329_p7 = scmp.lt.s32.totalorder %s323_s26, %s323_s26 }
  0x2d   :  { %p330_p8 = por %p329_p7, %p328_p6 }
  0x2f   :  { %p331_p9 = pnand %p330_p8, %p324_p5 }
  0x31   :  { %334 = shalt.err (!%p331_p9)
}
  0x32   :  { %s390_s0 = smov 64   ;;  %s391_s21 = smov 4  }
  0x33   :  { %45 = dma.hbm_to_vmem [thread:$0]  %s491_s2, 256, %s40_s17, [#allocation6], %s390_s0, %s390_s0, %s391_s21  }
  0x34   :  { %s392_s29 = smov [#allocation8]   ;;  %s335_s8 = scalar_lea.hbm %s492_s3, 256 }
  0x35   :  { %s51_s30 = sshll.u32 %s392_s29, 4  ;;  %p336_p10 = scmp.ne.s32.totalorder %s492_s3, %s335_s8  ;;  %s52_s30 = int_to_ptr.vmem [resolvable:$true] %s51_s30 }
  0x36   :  { %p339_p11 = scmp.lt.u32.totalorder %s335_s8, %s492_s3 }
  0x38   :  { %p341_p12 = pnand %p339_p11, %p336_p10 }
  0x3a   :  { %344 = shalt.err (!%p341_p12)
}
  0x3b   :  { %s345_s13 = scalar_lea.vmem %s52_s30, 256  ;;  %p350_p0 = scmp.lt.s32.totalorder %s52_s30, %s52_s30 }
  0x3c   :  { %p346_p13 = scmp.ne.s32.totalorder %s52_s30, %s345_s13  ;;  %p351_p1 = scmp.lt.s32.totalorder %s345_s13, %s345_s13 }
  0x3e   :  { %p352_p2 = por %p351_p1, %p350_p0 }
  0x40   :  { %p353_p3 = pnand %p352_p2, %p346_p13 }
  0x42   :  { %356 = shalt.err (!%p353_p3)
}
  0x43   :  { %57 = dma.hbm_to_vmem [thread:$0]  %s492_s3, 256, %s52_s30, [#allocation9], %s390_s0, %s390_s0, %s391_s21  }
  0x44   :  { %379 = dma.done.wait [#allocation3], 128  }
  0x45   :  { %380 = vsyncadd [#allocation3], 4294967168 }
  0x46   :  { %381 = dma.done.wait [#allocation6], 384  }
  0x47   :  { %382 = vsyncadd [#allocation6], 4294966912 }
  0x48   :  { %383 = dma.done.wait [#allocation9], 256  }
  0x49   :  { %384 = vsyncadd [#allocation9], 4294967040  ;;  %v393_v0 = vmov 0.0   ;;  %vm394_vm0 = vmmov 0   ;;  %v263_v1 = vld [vmem:[#allocation8] sm:$0xff]   ;;  %v264_v2 = vld [vmem:[#allocation7] sm:$0xff]  }
  0x4a   :  { %238 = vmatprep.subr.bf16.mxu0 %v393_v0  ;;  %246 = vmatprep.subr.bf16.mxu1 %v393_v0  ;;  %v265_v3 = vld [vmem:[#allocation8 + $0x8] sm:$0xff]   ;;  %v266_v4 = vld [vmem:[#allocation7 + $0x8] sm:$0xff]   ;;  %v73_v6 = vld [vmem:[#allocation2] sm:$0xff]  ;;  %vm97_vm1 = vcmask 261120   ;;  %s395_s15 = smov [#allocation10]   ;;  %vm206_vm2 = vcmask 257024  }
  0x4b   :  { %242 = vmatprep.mubr.msk.bf16.mxu0 %vm394_vm0, %v393_v0  ;;  %250 = vmatprep.mubr.msk.bf16.mxu1 %vm394_vm0, %v393_v0  ;;  %v75_v5 = vld [vmem:[#allocation5] sm:$0xff]  ;;  %v74_v8 = vpack.c.bf16 %v73_v6, %v73_v6  ;;  %v231_v11 = vld [vmem:[%s493_s4] ss:$0 sm:$0xff]  ;;  %s214_s16 = sshll.u32 %s395_s15, 4  ;;  %s215_s16 = int_to_ptr.vmem [resolvable:$true] %s214_s16 }
  0x4c   :  { %239 = vmatpush3.bf16.msra.mxu0 %v263_v1  ;;  %247 = vmatpush3.bf16.msra.mxu1 %v264_v2  ;;  %v76_v7 = vpack.c.bf16 %v75_v5, %v75_v5  ;;  %s357_s17 = scalar_lea.vmem %s215_s16, 64  ;;  %p362_p5 = scmp.lt.s32.totalorder %s215_s16, %s215_s16 }
  0x4d   :  { %240 = vmatprep.subr.bf16.mxu0 %v393_v0  ;;  %248 = vmatprep.subr.bf16.mxu1 %v393_v0  ;;  %p358_p4 = scmp.ne.s32.totalorder %s215_s16, %s357_s17  ;;  %p363_p6 = scmp.lt.s32.totalorder %s357_s17, %s357_s17 }
  0x4f   :  { %p364_p7 = por %p363_p6, %p362_p5 }
  0x50   :  { %241 = vmatpush3.bf16.msra.mxu0 %v265_v3  ;;  %249 = vmatpush3.bf16.msra.mxu1 %v266_v4 }
  0x51   :  { %p365_p8 = pnand %p364_p7, %p358_p4 }
  0x53   :  { %243 = vmatmul.mubr.msk.bf16.vlgmr.msra.gmra.mrb[0].mxu0 %vm97_vm1, %v76_v7  ;;  %251 = vmatmul.mubr.msk.bf16.vlgmr.msra.gmra.mrb[0].mxu1 %vm97_vm1, %v74_v8 }
 0x126   :  { %v135_v9 = vpop.f32.mrb[0].mxu0  ;;  %v190_v10 = vpop.f32.mrb[0].mxu1 }
 0x127   :  { %v244_v12 = vpop.f32.mrb[1].mxu0  ;;  %v191_v13 = vadd.f32 %v190_v10, %v135_v9  ;;  %v252_v14 = vpop.f32.mrb[1].mxu1 }
 0x128   :  { %v138_v15 = vpop.f32.mrb[2].mxu0  ;;  %v193_v16 = vpop.f32.mrb[2].mxu1 }
 0x129   :  { %v245_v17 = vpop.f32.mrb[3].mxu0  ;;  %v203_v18 = vadd.f32 %v231_v11, %v191_v13  ;;  %v253_v19 = vpop.f32.mrb[3].mxu1 }
 0x12b   :  { %267 = vtanh.f32 %v203_v18 }
 0x135   :  { %v268_v20 = vpop.eup %267 }
 0x136   :  { %v205_v21 = vpack.c.bf16 %v268_v20, %v268_v20 }
 0x138   :  { %207 = vst.msk [vmem:[#allocation10] sm:$0xf] %vm206_vm2, %v205_v21 }
 0x139   :  { %368 = shalt.err (!%p365_p8)
}
 0x13a   :  { %s369_s19 = scalar_lea.hbm %s494_s5, 64 }
 0x13b   :  { %p370_p9 = scmp.ne.s32.totalorder %s494_s5, %s369_s19  ;;  %p373_p10 = scmp.lt.u32.totalorder %s369_s19, %s494_s5 }
 0x13d   :  { %p375_p11 = pnand %p373_p10, %p370_p9 }
 0x13f   :  { %378 = shalt.err (!%p375_p11)
}
 0x140   :  { %217 = dma.vmem_to_hbm [thread:$0]  %s215_s16, 64, %s494_s5, [#allocation4]  }
 0x141   :  { %385 = dma.done.wait [#allocation4], 64  }
 0x142   :  { %386 = vsyncadd [#allocation4], 4294967232 }
 0x143   :  { %221 = vsyncpa [#allocation3], 1 }
 0x144   :  { %222 = vsyncpa [#allocation6], 1 }
 0x145   :  { %223 = vsyncpa [#allocation9], 1 }
 0x146   :  { %224 = vsyncpa [#allocation4], 1 }

</bundles_post_ra>
